<compile_context>
chip_gen: v6e
topology: v6e:2x2x1
jax: 0.10.0
libtpu: 0.0.40
codegen_flags: <defaults>
</compile_context>

<pallas_src>
import jax
import jax.numpy as jnp
from jax.experimental import pallas as pl
from jax.experimental.pallas import tpu as pltpu


def _round_up(x: int, m: int) -> int:
    return (x + m - 1) // m * m


def _patch_embed_kernel(x_ref, w_ref, b_ref, o_ref):
    # x_ref: (TM, K_pad)    streamed patch rows (compute dtype, e.g. bf16)
    # w_ref: (K_pad, N_pad) VMEM-resident projection weight (compute dtype)
    # b_ref: (1, N_pad)     VMEM-resident bias (f32)
    # o_ref: (TM, N_pad)    output tile
    acc = jnp.dot(x_ref[...], w_ref[...], preferred_element_type=jnp.float32)
    o_ref[...] = (acc + b_ref[...]).astype(o_ref.dtype)


def prepare_patch_embed_params(weight, bias, compute_dtype=jnp.bfloat16):
    """Repack Conv2d params into padded matmul layout. Call once (hoisted)."""
    embed_dim, C, kh, kw = weight.shape
    K = C * kh * kw
    K_pad = _round_up(K, 128)
    N_pad = _round_up(embed_dim, 128)
    # Conv2d weight (embed_dim, C, kh, kw) -> (K, embed_dim) matmul weight.
    w2d = weight.reshape(embed_dim, K).T
    w2d = jnp.pad(w2d, ((0, K_pad - K), (0, N_pad - embed_dim)))
    w2d = w2d.astype(compute_dtype)
    b2d = jnp.pad(bias.astype(jnp.float32), (0, N_pad - embed_dim)).reshape(1, N_pad)
    return w2d, b2d


def patch_embed(x, weight, bias, kernel_size=(4, 4), stride=(4, 4), padding=(0, 0),
                *, compute_dtype=jnp.bfloat16, tm=512, prepared=None):
    """Equivalent of PatchEmbed.forward.

    x:      (B, C, H, W)              -- NCHW, like the PyTorch module
    weight: (embed_dim, C, kh, kw)    -- PyTorch Conv2d weight layout
    bias:   (embed_dim,)
    returns (B, H//kh, W//kw, embed_dim)   (== conv output .permute(0,2,3,1))
    """
    B, C, H, W = x.shape
    kh, kw = kernel_size
    sh, sw = stride
    ph, pw = padding
    assert (kh, kw) == (sh, sw) and (ph, pw) == (0, 0), \
        "PatchEmbed uses kernel_size == stride, padding == 0 (non-overlapping patches)"
    Ho, Wo = H // kh, W // kw
    embed_dim = weight.shape[0]

    K = C * kh * kw
    K_pad = _round_up(K, 128)
    N_pad = _round_up(embed_dim, 128)

    if prepared is None:
        prepared = prepare_patch_embed_params(weight, bias, compute_dtype)
    w2d, b2d = prepared

    # --- glue (plain JAX): extract non-overlapping patches, flatten to rows ---
    # (B, C, Ho, kh, Wo, kw) -> (B, Ho, Wo, C, kh, kw) -> (M, K)
    M = B * Ho * Wo
    patches = x.reshape(B, C, Ho, kh, Wo, kw).transpose(0, 2, 4, 1, 3, 5)
    patches = patches.reshape(M, K).astype(compute_dtype)

    # --- tiling over M: weight resident, patches/output streamed ---
    TM = min(int(tm), _round_up(M, 8))
    TM = _round_up(TM, 8)
    M_pad = _round_up(M, TM)
    patches = jnp.pad(patches, ((0, M_pad - M), (0, K_pad - K)))
    grid = (M_pad // TM,)

    cbytes = jnp.dtype(compute_dtype).itemsize
    obytes = jnp.dtype(x.dtype).itemsize
    cost = pl.CostEstimate(
        flops=2 * M_pad * K_pad * N_pad,
        transcendentals=0,
        bytes_accessed=M_pad * K_pad * cbytes + K_pad * N_pad * cbytes
                       + M_pad * N_pad * obytes,
    )

    out = pl.pallas_call(
        _patch_embed_kernel,
        out_shape=jax.ShapeDtypeStruct((M_pad, N_pad), x.dtype),
        grid_spec=pltpu.PrefetchScalarGridSpec(
            num_scalar_prefetch=0,
            grid=grid,
            in_specs=[
                pl.BlockSpec((TM, K_pad), lambda i: (i, 0)),      # streamed
                pl.BlockSpec((K_pad, N_pad), lambda i: (0, 0)),   # resident
                pl.BlockSpec((1, N_pad), lambda i: (0, 0)),       # resident
            ],
            out_specs=pl.BlockSpec((TM, N_pad), lambda i: (i, 0)),
        ),
        compiler_params=pltpu.CompilerParams(
            dimension_semantics=("parallel",),       # v7x: shard M across 2 TCs
            vmem_limit_bytes=32 * 1024 * 1024,       # fits v7x's smaller VMEM
        ),
        cost_estimate=cost,
    )(patches, w2d, b2d)

    # (M_pad, N_pad) -> (B, Ho, Wo, embed_dim)
    return out[:M, :embed_dim].reshape(B, Ho, Wo, embed_dim)


if __name__ == "__main__":
    # Small, module-consistent shapes: B=2, in_chans=4, 16x16 image,
    # patch (kernel=stride) = (4, 4), embed_dim=32.
    B, C, H, W = 2, 4, 16, 16
    kh, kw = 4, 4
    embed_dim = 32

    key = jax.random.PRNGKey(0)
    kx, kw_, kb = jax.random.split(key, 3)
    x = jax.random.normal(kx, (B, C, H, W), dtype=jnp.float32)
    weight = jax.random.normal(kw_, (embed_dim, C, kh, kw), dtype=jnp.float32) * 0.02
    bias = jax.random.normal(kb, (embed_dim,), dtype=jnp.float32) * 0.01

    # Reference: XLA conv (NCHW) then permute(0, 2, 3, 1).
    ref = jax.lax.conv_general_dilated(
        x, weight, window_strides=(kh, kw), padding="VALID",
        dimension_numbers=("NCHW", "OIHW", "NCHW"),
    ) + bias.reshape(1, embed_dim, 1, 1)
    ref = jnp.transpose(ref, (0, 2, 3, 1))

    # Exact f32 path (tight check of kernel semantics; K/N padding is exact).
    out_f32 = patch_embed(x, weight, bias, kernel_size=(kh, kw), stride=(kh, kw),
                          compute_dtype=jnp.float32)
    out_f32 = jax.block_until_ready(out_f32)
    assert out_f32.shape == (B, H // kh, W // kw, embed_dim), out_f32.shape
    assert jnp.allclose(out_f32, ref, atol=1e-5, rtol=1e-5), \
        float(jnp.max(jnp.abs(out_f32 - ref)))

    # Default bf16-streamed path (the optimized config; f32 accumulation).
    out_bf16 = patch_embed(x, weight, bias, kernel_size=(kh, kw), stride=(kh, kw))
    out_bf16 = jax.block_until_ready(out_bf16)
    assert out_bf16.shape == (B, H // kh, W // kw, embed_dim), out_bf16.shape
    assert jnp.allclose(out_bf16.astype(jnp.float32), ref, atol=2e-2, rtol=2e-2), \
        float(jnp.max(jnp.abs(out_bf16.astype(jnp.float32) - ref)))

    print("KERNEL_OK")
</pallas_src>

<mosaic_0001>
module attributes {stable_mosaic.version = 11 : i64} {
  func.func @_patch_embed_kernel(%arg0: i32, %arg1: memref<32x128xf32, #tpu.memory_space<vmem>>, %arg2: memref<128x128xf32, #tpu.memory_space<vmem>>, %arg3: memref<1x128xf32, #tpu.memory_space<vmem>>, %arg4: memref<32x128xf32, #tpu.memory_space<vmem>>) attributes {dimension_semantics = [#tpu.dimension_semantics<parallel>], iteration_bounds = array<i64: 1>, scalar_prefetch = 0 : i64, scratch_operands = 0 : i64, tpu.core_type = #tpu.core_type<tc>, window_params = [{transform_indices = @transform_0, window_bounds = array<i64: 32, 128>}, {pipeline_mode = #tpu.pipeline_mode<synchronous>, transform_indices = @transform_1, window_bounds = array<i64: 128, 128>}, {pipeline_mode = #tpu.pipeline_mode<synchronous>, transform_indices = @transform_2, window_bounds = array<i64: 1, 128>}, {transform_indices = @transform_3, window_bounds = array<i64: 32, 128>}]} {
    %c0 = arith.constant 0 : index
    %c0_0 = arith.constant 0 : index
    %0 = vector.load %arg1[%c0, %c0_0] : memref<32x128xf32, #tpu.memory_space<vmem>>, vector<32x128xf32>
    %c0_1 = arith.constant 0 : index
    %c0_2 = arith.constant 0 : index
    %1 = vector.load %arg2[%c0_1, %c0_2] : memref<128x128xf32, #tpu.memory_space<vmem>>, vector<128x128xf32>
    %cst = arith.constant dense<0.000000e+00> : vector<32x128xf32>
    %2 = tpu.matmul %0, %1, %cst {dimension_numbers = #tpu.dot_dimension_numbers<[1], [0], [0], [1], [0, 0, 1, 1], [], []>} : vector<32x128xf32>, vector<128x128xf32>, vector<32x128xf32> -> vector<32x128xf32>
    %c0_3 = arith.constant 0 : index
    %c0_4 = arith.constant 0 : index
    %3 = vector.load %arg3[%c0_3, %c0_4] : memref<1x128xf32, #tpu.memory_space<vmem>>, vector<1x128xf32>
    %4 = vector.broadcast %3 : vector<1x128xf32> to vector<32x128xf32>
    %5 = arith.addf %2, %4 : vector<32x128xf32>
    %c0_5 = arith.constant 0 : index
    %c0_6 = arith.constant 0 : index
    %6 = vector.load %arg4[%c0_5, %c0_6] : memref<32x128xf32, #tpu.memory_space<vmem>>, vector<32x128xf32>
    tpu.vector_store %arg4[%c0_5, %c0_6], %5 {strides = array<i32>} : memref<32x128xf32, #tpu.memory_space<vmem>>, vector<32x128xf32>,
    return
  }
  func.func @transform_0(%arg0: i32) -> (i32, i32) {
    %c0_i32 = arith.constant 0 : i32
    %c0_i32_0 = arith.constant 0 : i32
    return %arg0, %c0_i32 : i32, i32
  }
  func.func @transform_1(%arg0: i32) -> (i32, i32) {
    %c0_i32 = arith.constant 0 : i32
    %c0_i32_0 = arith.constant 0 : i32
    %c0_i32_1 = arith.constant 0 : i32
    return %c0_i32, %c0_i32_0 : i32, i32
  }
  func.func @transform_2(%arg0: i32) -> (i32, i32) {
    %c0_i32 = arith.constant 0 : i32
    %c0_i32_0 = arith.constant 0 : i32
    %c0_i32_1 = arith.constant 0 : i32
    return %c0_i32, %c0_i32_0 : i32, i32
  }
  func.func @transform_3(%arg0: i32) -> (i32, i32) {
    %c0_i32 = arith.constant 0 : i32
    %c0_i32_0 = arith.constant 0 : i32
    return %arg0, %c0_i32 : i32, i32
  }
}

</mosaic_0001>

<bundles_post_ra>
// kernel: tpu_custom_call.1
= control target key start
LH: loop header
LB: loop body
LE: loop exit
PB: predicated region body
PF: predicated region fallthrough
CT: control target
= control target key end

     0   :  { %8 = vsyncpa [#allocation3], 0  ;;  %s385_s0 = inlined_call_operand.hbm [shape: f32[32,128], index: 0, kind: input, shape index: {}]   ;;  %s386_s1 = inlined_call_operand.hbm [shape: f32[128,128], index: 1, kind: input, shape index: {}]   ;;  %s387_s2 = inlined_call_operand.vmem [shape: f32[1,128], index: 2, kind: input, shape index: {}]   ;;  %s388_s3 = inlined_call_operand.hbm [shape: f32[32,128], index: 3, kind: output, shape index: {}]  }
   0x1   :  { %9 = vsyncpa [#allocation6], 0 }
   0x2   :  { %10 = vsyncpa [#allocation4], 0  ;;  %s339_s12 = smov [#allocation2]  }
   0x3   :  { %s16_s13 = sshll.u32 %s339_s12, 4  ;;  %s17_s13 = int_to_ptr.vmem [resolvable:$true] %s16_s13 }
   0x4   :  { %s281_s14 = scalar_lea.vmem %s17_s13, 512  ;;  %p286_p1 = scmp.lt.s32.totalorder %s17_s13, %s17_s13 }
   0x5   :  { %p282_p0 = scmp.ne.s32.totalorder %s17_s13, %s281_s14  ;;  %p287_p2 = scmp.lt.s32.totalorder %s281_s14, %s281_s14 }
   0x7   :  { %p288_p3 = por %p287_p2, %p286_p1 }
   0x9   :  { %p289_p4 = pnand %p288_p3, %p282_p0 }
   0xb   :  { %292 = shalt.err (!%p289_p4)
}
   0xc   :  { %s340_s15 = smov 128   ;;  %s341_s16 = smov 8  }
   0xd   :  { %22 = dma.hbm_to_vmem [thread:$0]  %s385_s0, 512, %s17_s13, [#allocation3], %s340_s15, %s340_s15, %s341_s16  }
   0xe   :  { %s342_s19 = smov [#allocation5]  }
   0xf   :  { %s28_s20 = sshll.u32 %s342_s19, 4  ;;  %s29_s20 = int_to_ptr.vmem [resolvable:$true] %s28_s20 }
  0x10   :  { %s301_s21 = scalar_lea.vmem %s29_s20, 2048  ;;  %p306_p6 = scmp.lt.s32.totalorder %s29_s20, %s29_s20 }
  0x11   :  { %p302_p5 = scmp.ne.s32.totalorder %s29_s20, %s301_s21  ;;  %p307_p7 = scmp.lt.s32.totalorder %s301_s21, %s301_s21 }
  0x13   :  { %p308_p8 = por %p307_p7, %p306_p6 }
  0x15   :  { %p309_p9 = pnand %p308_p8, %p302_p5 }
  0x17   :  { %312 = shalt.err (!%p309_p9)
}
  0x18   :  { %34 = dma.hbm_to_vmem [thread:$0]  %s386_s1, 2048, %s29_s20, [#allocation6], %s340_s15, %s340_s15, %s341_s16  }
  0x19   :  { %333 = dma.done.wait [#allocation3], 512  }
  0x1a   :  { %334 = vsyncadd [#allocation3], 4294966784 }
  0x1b   :  { %335 = dma.done.wait [#allocation6], 2048  }
  0x1c   :  { %336 = vsyncadd [#allocation6], 4294965248  ;;  %v62_v0 = vld [vmem:[#allocation5 + $0x78] sm:$0xff]  ;;  %v61_v1 = vld [vmem:[#allocation5 + $0x70] sm:$0xff]  ;;  %s343_s24 = smov [#allocation7]  }
  0x1d   :  { %198 = vmatprep.subr.mxu0 %v62_v0  ;;  %236 = vmatprep.subr.mxu1 %v62_v0  ;;  %v60_v2 = vld [vmem:[#allocation5 + $0x68] sm:$0xff]  ;;  %v59_v3 = vld [vmem:[#allocation5 + $0x60] sm:$0xff]  ;;  %v58_v4 = vld [vmem:[#allocation5 + $0x58] sm:$0xff]  ;;  %s164_s25 = sshll.u32 %s343_s24, 4  ;;  %s165_s25 = int_to_ptr.vmem [resolvable:$true] %s164_s25 }
  0x1e   :  { %199 = vmatpush3.msra.mxu0 %v62_v0  ;;  %252 = vmatpush3.msra.mxu1 %v62_v0  ;;  %v57_v5 = vld [vmem:[#allocation5 + $0x50] sm:$0xff]  ;;  %v56_v6 = vld [vmem:[#allocation5 + $0x48] sm:$0xff]  ;;  %v55_v7 = vld [vmem:[#allocation5 + $0x40] sm:$0xff]  ;;  %s313_s26 = scalar_lea.vmem %s165_s25, 512  ;;  %p318_p11 = scmp.lt.s32.totalorder %s165_s25, %s165_s25 }
  0x1f   :  { %200 = vmatprep.subr.mxu0 %v61_v1  ;;  %237 = vmatprep.subr.mxu1 %v61_v1  ;;  %v54_v8 = vld [vmem:[#allocation5 + $0x38] sm:$0xff]  ;;  %v53_v9 = vld [vmem:[#allocation5 + $0x30] sm:$0xff]  ;;  %v52_v10 = vld [vmem:[#allocation5 + $0x28] sm:$0xff]  ;;  %p314_p10 = scmp.ne.s32.totalorder %s165_s25, %s313_s26  ;;  %p319_p12 = scmp.lt.s32.totalorder %s313_s26, %s313_s26 }
  0x20   :  { %201 = vmatpush3.msra.mxu0 %v61_v1  ;;  %253 = vmatpush3.msra.mxu1 %v61_v1  ;;  %v51_v11 = vld [vmem:[#allocation5 + $0x20] sm:$0xff]  ;;  %v50_v12 = vld [vmem:[#allocation5 + $0x18] sm:$0xff]  ;;  %v49_v13 = vld [vmem:[#allocation5 + $0x10] sm:$0xff] }
  0x21   :  { %202 = vmatprep.subr.mxu0 %v60_v2  ;;  %238 = vmatprep.subr.mxu1 %v60_v2  ;;  %v48_v14 = vld [vmem:[#allocation5 + $0x8] sm:$0xff]  ;;  %v47_v15 = vld [vmem:[#allocation5] sm:$0xff]  ;;  %v45_v17 = vld [vmem:[#allocation2 + $0x10] sm:$0xff]  ;;  %p320_p13 = por %p319_p12, %p318_p11 }
  0x22   :  { %203 = vmatpush3.msra.mxu0 %v60_v2  ;;  %254 = vmatpush3.msra.mxu1 %v60_v2  ;;  %v43_v16 = vld [vmem:[#allocation2] sm:$0xff]  ;;  %v44_v18 = vld [vmem:[#allocation2 + $0x8] sm:$0xff]  ;;  %v46_v19 = vld [vmem:[#allocation2 + $0x18] sm:$0xff] }
  0x23   :  { %204 = vmatprep.subr.mxu0 %v59_v3  ;;  %239 = vmatprep.subr.mxu1 %v59_v3  ;;  %v177_v20 = vld [vmem:[%s387_s2] ss:$0 sm:$0xff]  ;;  %p321_p0 = pnand %p320_p13, %p314_p10 }
  0x24   :  { %205 = vmatpush3.msra.mxu0 %v59_v3  ;;  %255 = vmatpush3.msra.mxu1 %v59_v3 }
  0x25   :  { %206 = vmatprep.subr.mxu0 %v58_v4  ;;  %240 = vmatprep.subr.mxu1 %v58_v4 }
  0x26   :  { %207 = vmatpush3.msra.mxu0 %v58_v4  ;;  %256 = vmatpush3.msra.mxu1 %v58_v4 }
  0x27   :  { %208 = vmatprep.subr.mxu0 %v57_v5  ;;  %241 = vmatprep.subr.mxu1 %v57_v5 }
  0x28   :  { %209 = vmatpush3.msra.mxu0 %v57_v5  ;;  %257 = vmatpush3.msra.mxu1 %v57_v5 }
  0x29   :  { %210 = vmatprep.subr.mxu0 %v56_v6  ;;  %242 = vmatprep.subr.mxu1 %v56_v6 }
  0x2a   :  { %211 = vmatpush3.msra.mxu0 %v56_v6  ;;  %258 = vmatpush3.msra.mxu1 %v56_v6 }
  0x2b   :  { %212 = vmatprep.subr.mxu0 %v55_v7  ;;  %243 = vmatprep.subr.mxu1 %v55_v7 }
  0x2c   :  { %213 = vmatpush3.msra.mxu0 %v55_v7  ;;  %259 = vmatpush3.msra.mxu1 %v55_v7 }
  0x2d   :  { %214 = vmatprep.subr.mxu0 %v54_v8  ;;  %244 = vmatprep.subr.mxu1 %v54_v8 }
  0x2e   :  { %215 = vmatpush3.msra.mxu0 %v54_v8  ;;  %260 = vmatpush3.msra.mxu1 %v54_v8 }
  0x2f   :  { %216 = vmatprep.subr.mxu0 %v53_v9  ;;  %245 = vmatprep.subr.mxu1 %v53_v9 }
  0x30   :  { %217 = vmatpush3.msra.mxu0 %v53_v9  ;;  %261 = vmatpush3.msra.mxu1 %v53_v9 }
  0x31   :  { %218 = vmatprep.subr.mxu0 %v52_v10  ;;  %246 = vmatprep.subr.mxu1 %v52_v10 }
  0x32   :  { %219 = vmatpush3.msra.mxu0 %v52_v10  ;;  %262 = vmatpush3.msra.mxu1 %v52_v10 }
  0x33   :  { %220 = vmatprep.subr.mxu0 %v51_v11  ;;  %247 = vmatprep.subr.mxu1 %v51_v11 }
  0x34   :  { %221 = vmatpush3.msra.mxu0 %v51_v11  ;;  %263 = vmatpush3.msra.mxu1 %v51_v11 }
  0x35   :  { %222 = vmatprep.subr.mxu0 %v50_v12  ;;  %248 = vmatprep.subr.mxu1 %v50_v12 }
  0x36   :  { %223 = vmatpush3.msra.mxu0 %v50_v12  ;;  %264 = vmatpush3.msra.mxu1 %v50_v12 }
  0x37   :  { %224 = vmatprep.subr.mxu0 %v49_v13  ;;  %249 = vmatprep.subr.mxu1 %v49_v13 }
  0x38   :  { %225 = vmatpush3.msra.mxu0 %v49_v13  ;;  %265 = vmatpush3.msra.mxu1 %v49_v13 }
  0x39   :  { %226 = vmatprep.subr.mxu0 %v48_v14  ;;  %250 = vmatprep.subr.mxu1 %v48_v14 }
  0x3a   :  { %227 = vmatpush3.msra.mxu0 %v48_v14  ;;  %266 = vmatpush3.msra.mxu1 %v48_v14 }
  0x3b   :  { %228 = vmatprep.subr.mxu0 %v47_v15  ;;  %251 = vmatprep.subr.mxu1 %v47_v15 }
  0x3c   :  { %229 = vmatpush3.msra.mxu0 %v47_v15  ;;  %267 = vmatpush3.msra.mxu1 %v47_v15 }
  0x3d   :  { %230 = vmatprep.mubr.f32.mxu0 %v43_v16  ;;  %233 = vmatprep.mubr.f32.mxu1 %v45_v17 }
  0x3e   :  { %231 = vmatmul.mubr.f32.vlgmr.msra.gmra.mxu0 %v44_v18  ;;  %234 = vmatmul.mubr.f32.vlgmr.msra.gmra.mxu1 %v46_v19 }
  0xfe   :  { %v232_v21 = vpop.f32.mrf.mxu0  ;;  %v235_v22 = vpop.f32.mrf.mxu1 }
  0xff   :  { %v142_v23 = vadd.f32 %v232_v21, %v177_v20  ;;  %v152_v24 = vadd.f32 %v235_v22, %v177_v20 }
 0x100   :  { %v136_v25 = vpop.f32.mrf.mxu0  ;;  %v146_v26 = vpop.f32.mrf.mxu1 }
 0x101   :  { %156 = vst [vmem:[#allocation7 + $0x8] sm:$0xff] %v142_v23  ;;  %158 = vst [vmem:[#allocation7 + $0x18] sm:$0xff] %v152_v24  ;;  %v137_v27 = vadd.f32 %v177_v20, %v136_v25  ;;  %v147_v28 = vadd.f32 %v177_v20, %v146_v26 }
 0x103   :  { %155 = vst [vmem:[#allocation7] sm:$0xff] %v137_v27  ;;  %157 = vst [vmem:[#allocation7 + $0x10] sm:$0xff] %v147_v28 }
 0x104   :  { %324 = shalt.err (!%p321_p0)
}
 0x105   :  { %170 = dma.vmem_to_hbm [thread:$0]  %s165_s25, 512, %s388_s3, [#allocation4], %s340_s15, %s340_s15, %s341_s16  }
 0x106   :  { %337 = dma.done.wait [#allocation4], 512  }
 0x107   :  { %338 = vsyncadd [#allocation4], 4294966784 }
 0x108   :  { %174 = vsyncpa [#allocation3], 1 }
 0x109   :  { %175 = vsyncpa [#allocation6], 1 }
 0x10a   :  { %176 = vsyncpa [#allocation4], 1 }

</bundles_post_ra>
